<compile_context>
chip_gen: v5e
topology: v5e:2x2
jax: 0.10.0
libtpu: 0.0.40
codegen_flags: <defaults>
</compile_context>

<pallas_src>
import jax
import jax.numpy as jnp
from jax.experimental import pallas as pl
from jax.experimental.pallas import tpu as pltpu

LANES = 128            # every channel axis is padded to one full vreg lane width
WSLAB_COLS = 2 * LANES  # [conv1 | downsample] packed side by side


# ------------------------------ fused kernel -------------------------------- #

def _make_fused_tcn_kernel(block_meta):
    """block_meta: tuple of has_downsample flags (static, one per TemporalBlock)."""

    def kernel(x_ref, w_ref, b_ref, o_ref):
        h = x_ref[...].astype(jnp.float32)                     # (tb, 128) f32
        row, brow = 0, 0
        for has_ds in block_meta:
            hb = h.astype(jnp.bfloat16)
            if has_ds:
                # conv1 and the 1x1 downsample share the LHS -> one wide MXU push.
                w_a = w_ref[row:row + LANES, :]                # (128, 256) bf16
                b_a = b_ref[brow:brow + 1, :]                  # (1, 256)   f32
                z = jnp.dot(hb, w_a, preferred_element_type=jnp.float32) + b_a
                a = jnp.maximum(z[:, :LANES], 0.0)             # conv1 path (ReLU)
                res = z[:, LANES:]                             # downsample path
            else:
                w_a = w_ref[row:row + LANES, :LANES]           # (128, 128) bf16
                b_a = b_ref[brow:brow + 1, :LANES]
                z = jnp.dot(hb, w_a, preferred_element_type=jnp.float32) + b_a
                a = jnp.maximum(z, 0.0)
                res = h                                        # identity residual
            row += LANES
            brow += 1

            w2 = w_ref[row:row + LANES, :LANES]
            b2 = b_ref[brow:brow + 1, :LANES]
            out = jnp.maximum(
                jnp.dot(a.astype(jnp.bfloat16), w2,
                        preferred_element_type=jnp.float32) + b2, 0.0)
            # TemporalBlock.forward: return out + res (no trailing ReLU).
            h = out + res
            row += LANES
            brow += 1

        lw = w_ref[row:row + LANES, :LANES]
        lb = b_ref[brow:brow + 1, :LANES]
        o_ref[...] = (jnp.dot(h.astype(jnp.bfloat16), lw,
                              preferred_element_type=jnp.float32)
                      + lb).astype(o_ref.dtype)

    return kernel


def _choose_batch_tile(B, batch_tile):
    if batch_tile is None:
        # Multiple of the MXU height (128/256) when B is large; VMEM-safe on v7x.
        tb = min(B, 1024)
    else:
        tb = min(int(batch_tile), B)
    if tb < B:
        tb = max(8, (tb // 8) * 8)      # (8,128) BlockSpec constraint on sublanes
    return tb


def tcn_forward_pallas(prep, x, *, batch_tile=None):
    """x: (B, num_inputs) -> logits (B, n_classes), single fused pallas_call."""
    B, c_in = x.shape
    assert c_in <= LANES, "input channels must fit in one lane group"
    n_classes = prep["n_classes"]
    w_slab, b_slab = prep["w_slab"], prep["b_slab"]

    # Lane-pad the input once in the wrapper (zeros; padded weight rows are zero too).
    x_pad = jnp.pad(x.astype(jnp.float32), ((0, 0), (0, LANES - c_in)))

    tb = _choose_batch_tile(B, batch_tile)
    grid = (pl.cdiv(B, tb),)

    out = pl.pallas_call(
        _make_fused_tcn_kernel(prep["block_meta"]),
        out_shape=jax.ShapeDtypeStruct((B, LANES), x.dtype),
        grid=grid,
        in_specs=[
            pl.BlockSpec((tb, LANES), lambda i: (i, 0)),        # batch tile of x
            pl.BlockSpec(w_slab.shape, lambda i: (0, 0)),       # resident weight slab
            pl.BlockSpec(b_slab.shape, lambda i: (0, 0)),       # resident bias slab
        ],
        out_specs=pl.BlockSpec((tb, LANES), lambda i: (i, 0)),  # lane-dense output
        compiler_params=pltpu.CompilerParams(
            dimension_semantics=("parallel",)),
    )(x_pad, w_slab, b_slab)
    return out[:, :n_classes]


# --------------------------- parameters (glue) ------------------------------ #

def weight_norm_weight(v, g):
    """PyTorch weight_norm (dim=0): w = g * v / ||v||, norm over (in_ch, k)."""
    norm = jnp.sqrt(jnp.sum(v * v, axis=(1, 2), keepdims=True))
    return g[:, None, None] * v / norm


def _pad2(w, rows=LANES, cols=LANES):
    r, c = w.shape
    return jnp.pad(w, ((0, rows - r), (0, cols - c)))


def _pad1(b, n=LANES):
    return jnp.pad(b, (0, n - b.shape[0]))


def init_tcn_params(key, num_inputs, num_channels, kernel_size, n_classes=5):
    params = {"blocks": []}
    for i, out_ch in enumerate(num_channels):
        in_ch = num_inputs if i == 0 else num_channels[i - 1]
        key, *ks = jax.random.split(key, 9)
        blk = dict(
            v1=0.01 * jax.random.normal(ks[0], (out_ch, in_ch, kernel_size), jnp.float32),
            g1=1.0 + 0.1 * jax.random.normal(ks[1], (out_ch,), jnp.float32),
            b1=0.05 * jax.random.normal(ks[2], (out_ch,), jnp.float32),
            v2=0.01 * jax.random.normal(ks[3], (out_ch, out_ch, kernel_size), jnp.float32),
            g2=1.0 + 0.1 * jax.random.normal(ks[4], (out_ch,), jnp.float32),
            b2=0.05 * jax.random.normal(ks[5], (out_ch,), jnp.float32),
            wd=None, bd=None,
        )
        if in_ch != out_ch:  # downsample = Conv1d(in_ch, out_ch, 1)
            blk["wd"] = 0.01 * jax.random.normal(ks[6], (out_ch, in_ch, 1), jnp.float32)
            blk["bd"] = 0.05 * jax.random.normal(ks[7], (out_ch,), jnp.float32)
        params["blocks"].append(blk)
    key, k1, k2 = jax.random.split(key, 3)
    params["lin_w"] = 0.1 * jax.random.normal(k1, (n_classes, num_channels[-1]), jnp.float32)
    params["lin_b"] = 0.05 * jax.random.normal(k2, (n_classes,), jnp.float32)
    return params


def prepare_inference_params(params):
    """Precompute effective matmul weights ONCE (weight-norm, last-tap, transpose,
    conv1|downsample concat), lane-pad every channel axis to 128, and pack everything
    into one bf16 weight slab + one f32 bias slab with static row offsets."""
    w_segs, b_rows, block_meta = [], [], []
    zero_half = jnp.zeros((LANES, LANES), jnp.float32)
    zero_lane = jnp.zeros((LANES,), jnp.float32)

    for blk in params["blocks"]:
        w1 = weight_norm_weight(blk["v1"], blk["g1"])[:, :, -1].T   # (in, out)
        w2 = weight_norm_weight(blk["v2"], blk["g2"])[:, :, -1].T   # (out, out)
        has_ds = blk["wd"] is not None
        w1p, w2p = _pad2(w1), _pad2(w2)
        b1p, b2p = _pad1(blk["b1"]), _pad1(blk["b2"])
        if has_ds:
            wdp = _pad2(blk["wd"][:, :, 0].T)                       # (in, out) -> (128,128)
            bdp = _pad1(blk["bd"])
        else:
            wdp, bdp = zero_half, zero_lane
        w_segs += [jnp.concatenate([w1p, wdp], axis=1),             # (128, 256)
                   jnp.concatenate([w2p, zero_half], axis=1)]       # (128, 256)
        b_rows += [jnp.concatenate([b1p, bdp]),                     # (256,)
                   jnp.concatenate([b2p, zero_lane])]
        block_meta.append(has_ds)

    lwp = _pad2(params["lin_w"].T)                                  # (C_last,5) -> (128,128)
    lbp = _pad1(params["lin_b"])
    w_segs += [jnp.concatenate([lwp, zero_half], axis=1)]
    b_rows += [jnp.concatenate([lbp, zero_lane])]

    w_slab = jnp.concatenate(w_segs, axis=0).astype(jnp.bfloat16)   # (n*128, 256) bf16
    b_mat = jnp.stack(b_rows, axis=0).astype(jnp.float32)           # (n_bias, 256) f32
    pad_r = (-b_mat.shape[0]) % 8
    b_slab = jnp.pad(b_mat, ((0, pad_r), (0, 0)))                   # sublane-aligned
    return {"w_slab": w_slab, "b_slab": b_slab,
            "block_meta": tuple(block_meta),
            "n_classes": int(params["lin_w"].shape[0])}


# ------------------------------ JAX reference -------------------------------- #

def tcn_forward_ref(params, x, matmul_dtype=jnp.float32):
    """Pure-JAX reference with identical math; matmul operands cast to matmul_dtype,
    accumulation in f32 (mirrors the kernel when matmul_dtype=bfloat16)."""
    def mm(a, b):
        return jnp.dot(a.astype(matmul_dtype), b.astype(matmul_dtype),
                       preferred_element_type=jnp.float32)
    h = x.astype(jnp.float32)
    for blk in params["blocks"]:
        w1 = weight_norm_weight(blk["v1"], blk["g1"])[:, :, -1]
        w2 = weight_norm_weight(blk["v2"], blk["g2"])[:, :, -1]
        a = jnp.maximum(mm(h, w1.T) + blk["b1"], 0.0)
        out = jnp.maximum(mm(a, w2.T) + blk["b2"], 0.0)
        res = h if blk["wd"] is None else mm(h, blk["wd"][:, :, 0].T) + blk["bd"]
        h = out + res
    return mm(h, params["lin_w"].T) + params["lin_b"]


# ---------------------------------- main ------------------------------------ #

if __name__ == "__main__":
    key = jax.random.PRNGKey(0)
    k_param, k_x = jax.random.split(key)

    num_inputs = 4
    num_channels = [32, 32, 16]   # blocks 0 and 2: in != out (downsample);
                                  # block 1: in == out (identity residual)
    kernel_size = 3
    batch = 64

    params = init_tcn_params(k_param, num_inputs, num_channels, kernel_size)
    prep = prepare_inference_params(params)        # slabs built once, off the hot path
    x = jax.random.normal(k_x, (batch, num_inputs), jnp.float32)

    # Default tile (tb = min(B, 1024)) and an explicit multi-step grid (tb = 16).
    y = jax.block_until_ready(tcn_forward_pallas(prep, x))
    y_tiled = jax.block_until_ready(tcn_forward_pallas(prep, x, batch_tile=16))

    y_ref_bf16 = tcn_forward_ref(params, x, matmul_dtype=jnp.bfloat16)
    y_ref_f32 = tcn_forward_ref(params, x, matmul_dtype=jnp.float32)

    assert y.shape == (batch, 5), y.shape
    assert y_tiled.shape == (batch, 5), y_tiled.shape
    # Tight check vs a reference that rounds matmul operands to bf16 like the kernel.
    assert jnp.allclose(y, y_ref_bf16, atol=1e-3, rtol=1e-3)
    assert jnp.allclose(y_tiled, y_ref_bf16, atol=1e-3, rtol=1e-3)
    # Loose semantic sanity check vs the full-f32 reference.
    assert jnp.allclose(y, y_ref_f32, atol=5e-2, rtol=5e-2)

    print("KERNEL_OK")
</pallas_src>

<mosaic_0001>
module attributes {stable_mosaic.version = 11 : i64} {
  func.func @kernel(%arg0: i32, %arg1: memref<64x128xf32, #tpu.memory_space<vmem>>, %arg2: memref<896x256xbf16, #tpu.memory_space<vmem>>, %arg3: memref<8x256xf32, #tpu.memory_space<vmem>>, %arg4: memref<64x128xf32, #tpu.memory_space<vmem>>) attributes {dimension_semantics = [#tpu.dimension_semantics<parallel>], iteration_bounds = array<i64: 1>, scalar_prefetch = 0 : i64, scratch_operands = 0 : i64, tpu.core_type = #tpu.core_type<tc>, window_params = [{transform_indices = @transform_0, window_bounds = array<i64: 64, 128>}, {pipeline_mode = #tpu.pipeline_mode<synchronous>, transform_indices = @transform_1, window_bounds = array<i64: 896, 256>}, {pipeline_mode = #tpu.pipeline_mode<synchronous>, transform_indices = @transform_2, window_bounds = array<i64: 8, 256>}, {transform_indices = @transform_3, window_bounds = array<i64: 64, 128>}]} {
    %c0 = arith.constant 0 : index
    %c0_0 = arith.constant 0 : index
    %0 = vector.load %arg1[%c0, %c0_0] : memref<64x128xf32, #tpu.memory_space<vmem>>, vector<64x128xf32>
    %1 = arith.truncf %0 : vector<64x128xf32> to vector<64x128xbf16>
    %c0_1 = arith.constant 0 : index
    %c0_2 = arith.constant 0 : index
    %2 = vector.load %arg2[%c0_1, %c0_2] : memref<896x256xbf16, #tpu.memory_space<vmem>>, vector<128x256xbf16>
    %c0_3 = arith.constant 0 : index
    %c0_4 = arith.constant 0 : index
    %3 = vector.load %arg3[%c0_3, %c0_4] : memref<8x256xf32, #tpu.memory_space<vmem>>, vector<1x256xf32>
    %cst = arith.constant dense<0.000000e+00> : vector<64x256xf32>
    %4 = tpu.matmul %1, %2, %cst {dimension_numbers = #tpu.dot_dimension_numbers<[1], [0], [0], [1], [0, 0, 1, 1], [], []>} : vector<64x128xbf16>, vector<128x256xbf16>, vector<64x256xf32> -> vector<64x256xf32>
    %5 = vector.broadcast %3 : vector<1x256xf32> to vector<64x256xf32>
    %6 = arith.addf %4, %5 : vector<64x256xf32>
    %7 = vector.extract_strided_slice %6 {offsets = [0, 0], sizes = [64, 128], strides = [1, 1]} : vector<64x256xf32> to vector<64x128xf32>
    %cst_5 = arith.constant 0.000000e+00 : f32
    %8 = vector.broadcast %cst_5 : f32 to vector<64x128xf32>
    %9 = arith.maximumf %7, %8 : vector<64x128xf32>
    %10 = vector.extract_strided_slice %6 {offsets = [0, 128], sizes = [64, 128], strides = [1, 1]} : vector<64x256xf32> to vector<64x128xf32>
    %c128 = arith.constant 128 : index
    %c0_6 = arith.constant 0 : index
    %11 = vector.load %arg2[%c128, %c0_6] : memref<896x256xbf16, #tpu.memory_space<vmem>>, vector<128x128xbf16>
    %c1 = arith.constant 1 : index
    %c0_7 = arith.constant 0 : index
    %12 = vector.load %arg3[%c1, %c0_7] : memref<8x256xf32, #tpu.memory_space<vmem>>, vector<1x128xf32>
    %13 = arith.truncf %9 : vector<64x128xf32> to vector<64x128xbf16>
    %cst_8 = arith.constant dense<0.000000e+00> : vector<64x128xf32>
    %14 = tpu.matmul %13, %11, %cst_8 {dimension_numbers = #tpu.dot_dimension_numbers<[1], [0], [0], [1], [0, 0, 1, 1], [], []>} : vector<64x128xbf16>, vector<128x128xbf16>, vector<64x128xf32> -> vector<64x128xf32>
    %15 = vector.broadcast %12 : vector<1x128xf32> to vector<64x128xf32>
    %16 = arith.addf %14, %15 : vector<64x128xf32>
    %cst_9 = arith.constant 0.000000e+00 : f32
    %17 = vector.broadcast %cst_9 : f32 to vector<64x128xf32>
    %18 = arith.maximumf %16, %17 : vector<64x128xf32>
    %19 = arith.addf %18, %10 : vector<64x128xf32>
    %20 = arith.truncf %19 : vector<64x128xf32> to vector<64x128xbf16>
    %c256 = arith.constant 256 : index
    %c0_10 = arith.constant 0 : index
    %21 = vector.load %arg2[%c256, %c0_10] : memref<896x256xbf16, #tpu.memory_space<vmem>>, vector<128x128xbf16>
    %c2 = arith.constant 2 : index
    %c0_11 = arith.constant 0 : index
    %22 = vector.load %arg3[%c2, %c0_11] : memref<8x256xf32, #tpu.memory_space<vmem>>, vector<1x128xf32>
    %cst_12 = arith.constant dense<0.000000e+00> : vector<64x128xf32>
    %23 = tpu.matmul %20, %21, %cst_12 {dimension_numbers = #tpu.dot_dimension_numbers<[1], [0], [0], [1], [0, 0, 1, 1], [], []>} : vector<64x128xbf16>, vector<128x128xbf16>, vector<64x128xf32> -> vector<64x128xf32>
    %24 = vector.broadcast %22 : vector<1x128xf32> to vector<64x128xf32>
    %25 = arith.addf %23, %24 : vector<64x128xf32>
    %cst_13 = arith.constant 0.000000e+00 : f32
    %26 = vector.broadcast %cst_13 : f32 to vector<64x128xf32>
    %27 = arith.maximumf %25, %26 : vector<64x128xf32>
    %c384 = arith.constant 384 : index
    %c0_14 = arith.constant 0 : index
    %28 = vector.load %arg2[%c384, %c0_14] : memref<896x256xbf16, #tpu.memory_space<vmem>>, vector<128x128xbf16>
    %c3 = arith.constant 3 : index
    %c0_15 = arith.constant 0 : index
    %29 = vector.load %arg3[%c3, %c0_15] : memref<8x256xf32, #tpu.memory_space<vmem>>, vector<1x128xf32>
    %30 = arith.truncf %27 : vector<64x128xf32> to vector<64x128xbf16>
    %cst_16 = arith.constant dense<0.000000e+00> : vector<64x128xf32>
    %31 = tpu.matmul %30, %28, %cst_16 {dimension_numbers = #tpu.dot_dimension_numbers<[1], [0], [0], [1], [0, 0, 1, 1], [], []>} : vector<64x128xbf16>, vector<128x128xbf16>, vector<64x128xf32> -> vector<64x128xf32>
    %32 = vector.broadcast %29 : vector<1x128xf32> to vector<64x128xf32>
    %33 = arith.addf %31, %32 : vector<64x128xf32>
    %cst_17 = arith.constant 0.000000e+00 : f32
    %34 = vector.broadcast %cst_17 : f32 to vector<64x128xf32>
    %35 = arith.maximumf %33, %34 : vector<64x128xf32>
    %36 = arith.addf %35, %19 : vector<64x128xf32>
    %37 = arith.truncf %36 : vector<64x128xf32> to vector<64x128xbf16>
    %c512 = arith.constant 512 : index
    %c0_18 = arith.constant 0 : index
    %38 = vector.load %arg2[%c512, %c0_18] : memref<896x256xbf16, #tpu.memory_space<vmem>>, vector<128x256xbf16>
    %c4 = arith.constant 4 : index
    %c0_19 = arith.constant 0 : index
    %39 = vector.load %arg3[%c4, %c0_19] : memref<8x256xf32, #tpu.memory_space<vmem>>, vector<1x256xf32>
    %cst_20 = arith.constant dense<0.000000e+00> : vector<64x256xf32>
    %40 = tpu.matmul %37, %38, %cst_20 {dimension_numbers = #tpu.dot_dimension_numbers<[1], [0], [0], [1], [0, 0, 1, 1], [], []>} : vector<64x128xbf16>, vector<128x256xbf16>, vector<64x256xf32> -> vector<64x256xf32>
    %41 = vector.broadcast %39 : vector<1x256xf32> to vector<64x256xf32>
    %42 = arith.addf %40, %41 : vector<64x256xf32>
    %43 = vector.extract_strided_slice %42 {offsets = [0, 0], sizes = [64, 128], strides = [1, 1]} : vector<64x256xf32> to vector<64x128xf32>
    %cst_21 = arith.constant 0.000000e+00 : f32
    %44 = vector.broadcast %cst_21 : f32 to vector<64x128xf32>
    %45 = arith.maximumf %43, %44 : vector<64x128xf32>
    %46 = vector.extract_strided_slice %42 {offsets = [0, 128], sizes = [64, 128], strides = [1, 1]} : vector<64x256xf32> to vector<64x128xf32>
    %c640 = arith.constant 640 : index
    %c0_22 = arith.constant 0 : index
    %47 = vector.load %arg2[%c640, %c0_22] : memref<896x256xbf16, #tpu.memory_space<vmem>>, vector<128x128xbf16>
    %c5 = arith.constant 5 : index
    %c0_23 = arith.constant 0 : index
    %48 = vector.load %arg3[%c5, %c0_23] : memref<8x256xf32, #tpu.memory_space<vmem>>, vector<1x128xf32>
    %49 = arith.truncf %45 : vector<64x128xf32> to vector<64x128xbf16>
    %cst_24 = arith.constant dense<0.000000e+00> : vector<64x128xf32>
    %50 = tpu.matmul %49, %47, %cst_24 {dimension_numbers = #tpu.dot_dimension_numbers<[1], [0], [0], [1], [0, 0, 1, 1], [], []>} : vector<64x128xbf16>, vector<128x128xbf16>, vector<64x128xf32> -> vector<64x128xf32>
    %51 = vector.broadcast %48 : vector<1x128xf32> to vector<64x128xf32>
    %52 = arith.addf %50, %51 : vector<64x128xf32>
    %cst_25 = arith.constant 0.000000e+00 : f32
    %53 = vector.broadcast %cst_25 : f32 to vector<64x128xf32>
    %54 = arith.maximumf %52, %53 : vector<64x128xf32>
    %55 = arith.addf %54, %46 : vector<64x128xf32>
    %c768 = arith.constant 768 : index
    %c0_26 = arith.constant 0 : index
    %56 = vector.load %arg2[%c768, %c0_26] : memref<896x256xbf16, #tpu.memory_space<vmem>>, vector<128x128xbf16>
    %c6 = arith.constant 6 : index
    %c0_27 = arith.constant 0 : index
    %57 = vector.load %arg3[%c6, %c0_27] : memref<8x256xf32, #tpu.memory_space<vmem>>, vector<1x128xf32>
    %58 = arith.truncf %55 : vector<64x128xf32> to vector<64x128xbf16>
    %cst_28 = arith.constant dense<0.000000e+00> : vector<64x128xf32>
    %59 = tpu.matmul %58, %56, %cst_28 {dimension_numbers = #tpu.dot_dimension_numbers<[1], [0], [0], [1], [0, 0, 1, 1], [], []>} : vector<64x128xbf16>, vector<128x128xbf16>, vector<64x128xf32> -> vector<64x128xf32>
    %60 = vector.broadcast %57 : vector<1x128xf32> to vector<64x128xf32>
    %61 = arith.addf %59, %60 : vector<64x128xf32>
    %c0_29 = arith.constant 0 : index
    %c0_30 = arith.constant 0 : index
    %62 = vector.load %arg4[%c0_29, %c0_30] : memref<64x128xf32, #tpu.memory_space<vmem>>, vector<64x128xf32>
    tpu.vector_store %arg4[%c0_29, %c0_30], %61 {strides = array<i32>} : memref<64x128xf32, #tpu.memory_space<vmem>>, vector<64x128xf32>,
    return
  }
  func.func @transform_0(%arg0: i32) -> (i32, i32) {
    %c0_i32 = arith.constant 0 : i32
    %c0_i32_0 = arith.constant 0 : i32
    return %arg0, %c0_i32 : i32, i32
  }
  func.func @transform_1(%arg0: i32) -> (i32, i32) {
    %c0_i32 = arith.constant 0 : i32
    %c0_i32_0 = arith.constant 0 : i32
    %c0_i32_1 = arith.constant 0 : i32
    return %c0_i32, %c0_i32_0 : i32, i32
  }
  func.func @transform_2(%arg0: i32) -> (i32, i32) {
    %c0_i32 = arith.constant 0 : i32
    %c0_i32_0 = arith.constant 0 : i32
    %c0_i32_1 = arith.constant 0 : i32
    return %c0_i32, %c0_i32_0 : i32, i32
  }
  func.func @transform_3(%arg0: i32) -> (i32, i32) {
    %c0_i32 = arith.constant 0 : i32
    %c0_i32_0 = arith.constant 0 : i32
    return %arg0, %c0_i32 : i32, i32
  }
}

</mosaic_0001>

<bundles_post_ra>
// kernel: tpu_custom_call.1
= control target key start
LH: loop header
LB: loop body
LE: loop exit
PB: predicated region body
PF: predicated region fallthrough
CT: control target
= control target key end

     0   :  { %8 = vsyncpa [#allocation3], 0  ;;  %s1602_s0 = inlined_call_operand.hbm [shape: f32[64,128], index: 0, kind: input, shape index: {}]   ;;  %s1603_s1 = inlined_call_operand.hbm [shape: bf16[896,256], index: 1, kind: input, shape index: {}]   ;;  %s1604_s2 = inlined_call_operand.hbm [shape: f32[8,256], index: 2, kind: input, shape index: {}]   ;;  %s1605_s3 = inlined_call_operand.hbm [shape: f32[64,128], index: 3, kind: output, shape index: {}]  }
   0x1   :  { %9 = vsyncpa [#allocation6], 0 }
   0x2   :  { %10 = vsyncpa [#allocation4], 0  ;;  %s28_s14 = sshll.u32 %s1603_s1, 4  ;;  %s1471_s15 = smov [#allocation5]   ;;  %s29_s14 = int_to_ptr.hbm [resolvable:$true] %s28_s14 }
   0x3   :  { %s30_s16 = sshll.u32 %s1471_s15, 4  ;;  %s15_s19 = sshll.u32 %s1602_s0, 4  ;;  %s31_s16 = int_to_ptr.vmem [resolvable:$true] %s30_s16  ;;  %s16_s19 = int_to_ptr.hbm [resolvable:$true] %s15_s19 }
   0x4   :  { %s1472_s20 = smov 128   ;;  %s1473_s21 = smov 8  }
   0x5   :  { %36 = dma.hbm_to_vmem [thread:$0]  %s29_s14, 14336, %s31_s16, [#allocation6], %s1472_s20, %s1472_s20, %s1473_s21  }
   0x6   :  { %s1474_s22 = smov [#allocation2]   ;;  %s42_s1 = sshll.u32 %s1604_s2, 4  ;;  %s43_s1 = int_to_ptr.hbm [resolvable:$true] %s42_s1 }
   0x7   :  { %s17_s23 = sshll.u32 %s1474_s22, 4  ;;  %s1475_s0 = smov [#allocation7]   ;;  %s18_s23 = int_to_ptr.vmem [resolvable:$true] %s17_s23 }
   0x8   :  { %23 = dma.hbm_to_vmem [thread:$0]  %s16_s19, 1024, %s18_s23, [#allocation3], %s1472_s20, %s1472_s20, %s1473_s21  }
   0x9   :  { %s44_s26 = sshll.u32 %s1475_s0, 4  ;;  %s45_s26 = int_to_ptr.vmem [resolvable:$true] %s44_s26 }
   0xa   :  { %47 = dma.hbm_to_vmem [thread:$0]  %s43_s1, 256, %s45_s26, [#allocation6]  }
   0xb   :  { %1465 = dma.done.wait [#allocation3], 1024  }
   0xc   :  { %1466 = vsyncadd [#allocation3], 4294966272 }
   0xd   :  { %1467 = dma.done.wait [#allocation6], 14592  }
   0xe   :  { %1468 = vsyncadd [#allocation6], 4294952704  ;;  %v1045_v0 = vld [vmem:[#allocation5 + $0x70] sm:$0xf]  ;;  %v1290_v1 = vld [vmem:[#allocation5 + $0x74] sm:$0xf0] }
   0xf   :  { %v1037_v2 = vld [vmem:[#allocation5 + $0x60] sm:$0xf]  ;;  %v1046_v3 = vor.u32 %v1290_v1, %v1045_v0  ;;  %v1288_v4 = vld [vmem:[#allocation5 + $0x64] sm:$0xf0]  ;;  %v1029_v6 = vld [vmem:[#allocation5 + $0x50] sm:$0xf] }
  0x10   :  { %v1038_v5 = vor.u32 %v1288_v4, %v1037_v2  ;;  %v1286_v7 = vld [vmem:[#allocation5 + $0x54] sm:$0xf0]  ;;  %v1021_v9 = vld [vmem:[#allocation5 + $0x40] sm:$0xf]  ;;  %v1284_v10 = vld [vmem:[#allocation5 + $0x44] sm:$0xf0] }
  0x11   :  { %174 = vmatpush.bf16.msra.mxu0 %v1046_v3  ;;  %1347 = vmatpush.bf16.msra.mxu1 %v1046_v3  ;;  %v1030_v8 = vor.u32 %v1286_v7, %v1029_v6  ;;  %v1022_v11 = vor.u32 %v1284_v10, %v1021_v9  ;;  %v1013_v12 = vld [vmem:[#allocation5 + $0x30] sm:$0xf]  ;;  %v1282_v13 = vld [vmem:[#allocation5 + $0x34] sm:$0xf0]  ;;  %v1005_v15 = vld [vmem:[#allocation5 + $0x20] sm:$0xf] }
  0x12   :  { %v1014_v14 = vor.u32 %v1282_v13, %v1013_v12  ;;  %v1280_v16 = vld [vmem:[#allocation5 + $0x24] sm:$0xf0]  ;;  %v997_v18 = vld [vmem:[#allocation5 + $0x10] sm:$0xf]  ;;  %v1278_v19 = vld [vmem:[#allocation5 + $0x14] sm:$0xf0] }
  0x13   :  { %v1006_v17 = vor.u32 %v1280_v16, %v1005_v15  ;;  %v1081_v20 = vld [vmem:[#allocation5 + $0xf0] sm:$0xf]  ;;  %v1298_v21 = vld [vmem:[#allocation5 + $0xf4] sm:$0xf0]  ;;  %v1077_v23 = vld [vmem:[#allocation5 + $0xe0] sm:$0xf]  ;;  %v998_v25 = vor.u32 %v1278_v19, %v997_v18 }
  0x14   :  { %v1082_v22 = vor.u32 %v1298_v21, %v1081_v20  ;;  %v1297_v24 = vld [vmem:[#allocation5 + $0xe4] sm:$0xf0]  ;;  %v989_v26 = vld [vmem:[#allocation5] sm:$0xf]  ;;  %v1289_v28 = vld [vmem:[#allocation5 + $0x74] sm:$0xf] }
  0x15   :  { %175 = vmatpush.bf16.msra.mxu0 %v1038_v5  ;;  %1348 = vmatpush.bf16.msra.mxu1 %v1038_v5  ;;  %v1276_v27 = vld [vmem:[#allocation5 + $0x4] sm:$0xf0]  ;;  %v1078_v29 = vor.u32 %v1297_v24, %v1077_v23  ;;  %v1047_v30 = vld [vmem:[#allocation5 + $0x78] sm:$0xf0]  ;;  %v1073_v31 = vld [vmem:[#allocation5 + $0xd0] sm:$0xf] }
  0x16   :  { %309 = vmatpush.bf16.msra.mxu2 %v1082_v22  ;;  %v1296_v32 = vld [vmem:[#allocation5 + $0xd4] sm:$0xf0]  ;;  %v60_v33 = vld [vmem:[#allocation2] sm:$0xff]  ;;  %v990_v34 = vor.u32 %v1276_v27, %v989_v26  ;;  %v61_v35 = vld [vmem:[#allocation2 + $0x8] sm:$0xff]  ;;  %v1050_v38 = vor.u32 %v1289_v28, %v1047_v30  ;;  %s1476_s2 = smov [#allocation8]   ;;  %s973_s30 = sshll.u32 %s1605_s3, 4  ;;  %s974_s30 = int_to_ptr.hbm [resolvable:$true] %s973_s30 }
  0x17   :  { %v64_v36 = vld [vmem:[#allocation2 + $0x20] sm:$0xff]  ;;  %v65_v37 = vld [vmem:[#allocation2 + $0x28] sm:$0xff]  ;;  %v1074_v40 = vor.u32 %v1296_v32, %v1073_v31  ;;  %v68_v44 = vpack.c.bf16 %v61_v35, %v60_v33  ;;  %v1285_v48 = vld [vmem:[#allocation5 + $0x54] sm:$0xf]  ;;  %s971_s27 = sshll.u32 %s1476_s2, 4  ;;  %s972_s27 = int_to_ptr.vmem [resolvable:$true] %s971_s27 }
  0x18   :  { %v1287_v39 = vld [vmem:[#allocation5 + $0x64] sm:$0xf]  ;;  %v1039_v41 = vld [vmem:[#allocation5 + $0x68] sm:$0xf0]  ;;  %v1069_v42 = vld [vmem:[#allocation5 + $0xc0] sm:$0xf]  ;;  %v1512_v45 = vpack.c.bf16 %v65_v37, %v64_v36 }
  0x19   :  { %176 = vmatpush.bf16.msra.mxu0 %v1030_v8  ;;  %1349 = vmatpush.bf16.msra.mxu1 %v1030_v8  ;;  %v1295_v43 = vld [vmem:[#allocation5 + $0xc4] sm:$0xf0]  ;;  %v1042_v46 = vor.u32 %v1287_v39, %v1039_v41  ;;  %v1031_v49 = vld [vmem:[#allocation5 + $0x58] sm:$0xf0]  ;;  %v1283_v51 = vld [vmem:[#allocation5 + $0x44] sm:$0xf] }
  0x1a   :  { %310 = vmatpush.bf16.msra.mxu2 %v1078_v29  ;;  %v1070_v47 = vor.u32 %v1295_v43, %v1069_v42  ;;  %v1034_v50 = vor.u32 %v1285_v48, %v1031_v49  ;;  %v1023_v52 = vld [vmem:[#allocation5 + $0x48] sm:$0xf0]  ;;  %v62_v54 = vld [vmem:[#allocation2 + $0x10] sm:$0xff]  ;;  %v63_v55 = vld [vmem:[#allocation2 + $0x18] sm:$0xff] }
  0x1b   :  { %v1026_v53 = vor.u32 %v1283_v51, %v1023_v52  ;;  %v66_v56 = vld [vmem:[#allocation2 + $0x30] sm:$0xff]  ;;  %v67_v57 = vld [vmem:[#allocation2 + $0x38] sm:$0xff]  ;;  %v69_v58 = vpack.c.bf16 %v63_v55, %v62_v54  ;;  %v1279_v2 = vld [vmem:[#allocation5 + $0x24] sm:$0xf] }
  0x1c   :  { %v71_v59 = vpack.c.bf16 %v67_v57, %v66_v56  ;;  %v1281_v60 = vld [vmem:[#allocation5 + $0x34] sm:$0xf]  ;;  %v1015_v61 = vld [vmem:[#allocation5 + $0x38] sm:$0xf0]  ;;  %v1065_v62 = vld [vmem:[#allocation5 + $0xb0] sm:$0xf] }
  0x1d   :  { %177 = vmatpush.bf16.msra.mxu0 %v1022_v11  ;;  %1350 = vmatpush.bf16.msra.mxu1 %v1022_v11  ;;  %v1018_v63 = vor.u32 %v1281_v60, %v1015_v61  ;;  %v1294_v0 = vld [vmem:[#allocation5 + $0xb4] sm:$0xf0]  ;;  %v1007_v3 = vld [vmem:[#allocation5 + $0x28] sm:$0xf0]  ;;  %v1061_v4 = vld [vmem:[#allocation5 + $0xa0] sm:$0xf] }
  0x1e   :  { %311 = vmatpush.bf16.msra.mxu2 %v1074_v40  ;;  %v1066_v1 = vor.u32 %v1294_v0, %v1065_v62  ;;  %v1010_v5 = vor.u32 %v1279_v2, %v1007_v3  ;;  %v1293_v6 = vld [vmem:[#allocation5 + $0xa4] sm:$0xf0]  ;;  %v1277_v8 = vld [vmem:[#allocation5 + $0x14] sm:$0xf]  ;;  %v999_v9 = vld [vmem:[#allocation5 + $0x18] sm:$0xf0] }
  0x1f   :  { %v1062_v7 = vor.u32 %v1293_v6, %v1061_v4  ;;  %v1057_v10 = vld [vmem:[#allocation5 + $0x90] sm:$0xf]  ;;  %v1002_v11 = vor.u32 %v1277_v8, %v999_v9  ;;  %v1292_v12 = vld [vmem:[#allocation5 + $0x94] sm:$0xf0]  ;;  %v991_v15 = vld [vmem:[#allocation5 + $0x8] sm:$0xf0] }
  0x20   :  { %v1058_v13 = vor.u32 %v1292_v12, %v1057_v10  ;;  %v1053_v16 = vld [vmem:[#allocation5 + $0x80] sm:$0xf]  ;;  %v1291_v18 = vld [vmem:[#allocation5 + $0x84] sm:$0xf0]  ;;  %v1306_v39 = vld [vmem:[#allocation5 + $0x174] sm:$0xf0] }
  0x21   :  { %178 = vmatpush.bf16.msra.mxu0 %v1014_v14  ;;  %1351 = vmatpush.bf16.msra.mxu1 %v1014_v14  ;;  %v1275_v14 = vld [vmem:[#allocation5 + $0x4] sm:$0xf]  ;;  %v1054_v19 = vor.u32 %v1291_v18, %v1053_v16  ;;  %v1515_v20 = vld [vmem:[#allocation7] ss:$8 sm:$0x3] }
  0x22   :  { %312 = vmatpush.bf16.msra.mxu2 %v1070_v47  ;;  %v90_v22 = vperm.slane %v1515_v20, 0  ;;  %v1109_v40 = vld [vmem:[#allocation5 + $0x160] sm:$0xf]  ;;  %v1305_v42 = vld [vmem:[#allocation5 + $0x164] sm:$0xf0] }
  0x23   :  { %v1110_v43 = vor.u32 %v1305_v42, %v1109_v40  ;;  %v1105_v56 = vld [vmem:[#allocation5 + $0x150] sm:$0xf]  ;;  %v1304_v57 = vld [vmem:[#allocation5 + $0x154] sm:$0xf0]  ;;  %v1303_v60 = vld [vmem:[#allocation5 + $0x144] sm:$0xf0] }
  0x24   :  { %v1097_v62 = vld [vmem:[#allocation5 + $0x130] sm:$0xf]  ;;  %v1301_v2 = vld [vmem:[#allocation5 + $0x124] sm:$0xf0]  ;;  %v1141_v42 = vld [vmem:[#allocation5 + $0x1e0] sm:$0xf] }
  0x25   :  { %179 = vmatpush.bf16.msra.mxu0 %v1006_v17  ;;  %1352 = vmatpush.bf16.msra.mxu1 %v1006_v17  ;;  %v994_v17 = vor.u32 %v1275_v14, %v991_v15  ;;  %v1089_v4 = vld [vmem:[#allocation5 + $0x110] sm:$0xf]  ;;  %v1299_v8 = vld [vmem:[#allocation5 + $0x104] sm:$0xf0]  ;;  %v1522_v14 = vperm.slane %v1515_v20, 1 }
  0x26   :  { %313 = vmatpush.bf16.msra.mxu2 %v1066_v1  ;;  %v1093_v1 = vld [vmem:[#allocation5 + $0x120] sm:$0xf]  ;;  %v1145_v40 = vld [vmem:[#allocation5 + $0x1f0] sm:$0xf] }
  0x27   :  { %v1094_v3 = vor.u32 %v1301_v2, %v1093_v1 }
  0x29   :  { %180 = vmatpush.bf16.msra.mxu0 %v998_v25  ;;  %1353 = vmatpush.bf16.msra.mxu1 %v998_v25 }
  0x2a   :  { %314 = vmatpush.bf16.msra.mxu2 %v1062_v7  ;;  %v1085_v7 = vld [vmem:[#allocation5 + $0x100] sm:$0xf] }
  0x2b   :  { %v1086_v9 = vor.u32 %v1299_v8, %v1085_v7 }
  0x2d   :  { %181 = vmatpush.bf16.msra.mxu0 %v990_v34  ;;  %1354 = vmatpush.bf16.msra.mxu1 %v990_v34 }
  0x2e   :  { %315 = vmatpush.bf16.msra.mxu2 %v1058_v13  ;;  %v1519_v13 = vld [vmem:[#allocation7 + $0x1] ss:$0 sm:$0xff] }
  0x30   :  { %182 = vmatmul.bf16.vlgmr.msra.gmra.mxu0 %v68_v44  ;;  %192 = vmatmul.bf16.vlgmr.msra.gmra.mxu1 %v1512_v45 }
  0x31   :  { %203 = vmatpush.bf16.msrb.mxu1 %v1050_v38  ;;  %v1113_v38 = vld [vmem:[#allocation5 + $0x170] sm:$0xf] }
  0x32   :  { %316 = vmatpush.bf16.msra.mxu2 %v1054_v19  ;;  %v1114_v41 = vor.u32 %v1306_v39, %v1113_v38 }
  0x34   :  { %423 = vmatpush.bf16.msra.mxu3 %v1114_v41  ;;  %v1314_v41 = vld [vmem:[#allocation5 + $0x1f4] sm:$0xf0] }
  0x35   :  { %204 = vmatpush.bf16.msrb.mxu1 %v1042_v46 }
  0x38   :  { %424 = vmatpush.bf16.msra.mxu3 %v1110_v43  ;;  %v1146_v43 = vor.u32 %v1314_v41, %v1145_v40 }
  0x39   :  { %205 = vmatpush.bf16.msrb.mxu1 %v1034_v50 }
  0x3a   :  { %529 = vmatpush.bf16.msrb.mxu0 %v1146_v43  ;;  %v1205_v43 = vld [vmem:[#allocation5 + $0x270] sm:$0xf] }
  0x3d   :  { %206 = vmatpush.bf16.msrb.mxu1 %v1026_v53 }
  0x40   :  { %187 = vmatmul.bf16.gmra.mxu0 %v69_v58  ;;  %197 = vmatmul.bf16.gmra.mxu1 %v71_v59 }
  0x41   :  { %207 = vmatpush.bf16.msrb.mxu1 %v1018_v63  ;;  %v1302_v63 = vld [vmem:[#allocation5 + $0x134] sm:$0xf0] }
  0x42   :  { %v1098_v0 = vor.u32 %v1302_v63, %v1097_v62  ;;  %v1129_v62 = vld [vmem:[#allocation5 + $0x1b0] sm:$0xf]  ;;  %v1310_v63 = vld [vmem:[#allocation5 + $0x1b4] sm:$0xf0] }
  0x45   :  { %208 = vmatpush.bf16.msrb.mxu1 %v1010_v5  ;;  %v1300_v5 = vld [vmem:[#allocation5 + $0x114] sm:$0xf0] }
  0x46   :  { %v1090_v6 = vor.u32 %v1300_v5, %v1089_v4 }
  0x49   :  { %209 = vmatpush.bf16.msrb.mxu1 %v1002_v11 }
  0x4d   :  { %210 = vmatpush.bf16.msrb.mxu1 %v994_v17 }
  0x50   :  { %211 = vmatmul.bf16.vlgmr.msrb.gmra.mxu1 %v68_v44 }
  0x60   :  { %216 = vmatmul.bf16.gmra.mxu1 %v69_v58  ;;  %v1101_v58 = vld [vmem:[#allocation5 + $0x140] sm:$0xf] }
  0x61   :  { %v1102_v61 = vor.u32 %v1303_v60, %v1101_v58 }
  0x70   :  { %221 = vmatmul.bf16.gmra.mxu1 %v1512_v45 }
  0x80   :  { %226 = vmatmul.bf16.gmra.mxu1 %v71_v59  ;;  %v1106_v59 = vor.u32 %v1304_v57, %v1105_v56  ;;  %v1311_v56 = vld [vmem:[#allocation5 + $0x1c4] sm:$0xf0] }
  0x82   :  { %425 = vmatpush.bf16.msra.mxu3 %v1106_v59 }
  0x86   :  { %426 = vmatpush.bf16.msra.mxu3 %v1102_v61 }
  0x8a   :  { %427 = vmatpush.bf16.msra.mxu3 %v1098_v0 }
  0x8e   :  { %428 = vmatpush.bf16.msra.mxu3 %v1094_v3  ;;  %v1130_v3 = vor.u32 %v1310_v63, %v1129_v62  ;;  %v1191_v62 = vld [vmem:[#allocation5 + $0x258] sm:$0xf0] }
  0x92   :  { %429 = vmatpush.bf16.msra.mxu3 %v1090_v6 }
  0x96   :  { %430 = vmatpush.bf16.msra.mxu3 %v1086_v9 }
  0xad   :  { %v183_v21 = vpop.f32.mrf.mxu0  ;;  %v193_v30 = vpop.f32.mrf.mxu1 }
  0xae   :  { %v184_v23 = vadd.f32 %v183_v21, %v90_v22  ;;  %v194_v44 = vadd.f32 %v193_v30, %v90_v22 }
  0xb0   :  { %v232_v26 = vmax.f32 %v184_v23, 0.0  ;;  %v236_v47 = vmax.f32 %v194_v44, 0.0  ;;  %v1313_v44 = vld [vmem:[#allocation5 + $0x1e4] sm:$0xf0] }
  0xb5   :  { %v185_v24 = vpop.f32.mrf.mxu0  ;;  %v195_v37 = vpop.f32.mrf.mxu1 }
  0xb6   :  { %v186_v25 = vadd.f32 %v185_v24, %v90_v22  ;;  %v196_v45 = vadd.f32 %v195_v37, %v90_v22 }
  0xb8   :  { %v233_v27 = vmax.f32 %v186_v25, 0.0  ;;  %v237_v48 = vmax.f32 %v196_v45, 0.0 }
  0xba   :  { %v257_v28 = vpack.c.bf16 %v233_v27, %v232_v26  ;;  %v259_v49 = vpack.c.bf16 %v237_v48, %v236_v47  ;;  %v1137_v48 = vld [vmem:[#allocation5 + $0x1d0] sm:$0xf] }
  0xbc   :  { %317 = vmatmul.bf16.vlgmr.msra.gmra.mxu2 %v257_v28 }
  0xbd   :  { %v188_v29 = vpop.f32.mrf.mxu0  ;;  %v198_v46 = vpop.f32.mrf.mxu1 }
  0xbe   :  { %v189_v31 = vadd.f32 %v188_v29, %v90_v22  ;;  %v199_v51 = vadd.f32 %v198_v46, %v90_v22  ;;  %v1142_v46 = vor.u32 %v1313_v44, %v1141_v42  ;;  %v1330_v44 = vld [vmem:[#allocation5 + $0x274] sm:$0xf0] }
  0xc0   :  { %v234_v34 = vmax.f32 %v189_v31, 0.0  ;;  %v238_v53 = vmax.f32 %v199_v51, 0.0  ;;  %530 = vmatpush.bf16.msrb.mxu0 %v1142_v46 }
  0xc5   :  { %v190_v32 = vpop.f32.mrf.mxu0  ;;  %v200_v50 = vpop.f32.mrf.mxu1 }
  0xc6   :  { %v191_v33 = vadd.f32 %v190_v32, %v90_v22  ;;  %v201_v52 = vadd.f32 %v200_v50, %v90_v22 }
  0xc8   :  { %v235_v35 = vmax.f32 %v191_v33, 0.0  ;;  %v239_v54 = vmax.f32 %v201_v52, 0.0 }
  0xca   :  { %v258_v36 = vpack.c.bf16 %v235_v35, %v234_v34  ;;  %v260_v55 = vpack.c.bf16 %v239_v54, %v238_v53 }
  0xcc   :  { %322 = vmatmul.bf16.gmra.mxu2 %v258_v36 }
  0xcd   :  { %v212_v10 = vpop.f32.mrf.mxu1 }
  0xce   :  { %v213_v18 = vadd.f32 %v212_v10, %v1522_v14 }
  0xd5   :  { %v214_v11 = vpop.f32.mrf.mxu1 }
  0xd6   :  { %v215_v22 = vadd.f32 %v214_v11, %v1522_v14 }
  0xdc   :  { %327 = vmatmul.bf16.gmra.mxu2 %v259_v49  ;;  %v1312_v49 = vld [vmem:[#allocation5 + $0x1d4] sm:$0xf0] }
  0xdd   :  { %v217_v16 = vpop.f32.mrf.mxu1  ;;  %v1138_v51 = vor.u32 %v1312_v49, %v1137_v48  ;;  %v1328_v48 = vld [vmem:[#allocation5 + $0x264] sm:$0xf0] }
  0xde   :  { %v218_v30 = vadd.f32 %v217_v16, %v1522_v14 }
  0xdf   :  { %531 = vmatpush.bf16.msrb.mxu0 %v1138_v51  ;;  %v1329_v51 = vld [vmem:[#allocation5 + $0x274] sm:$0xf] }
  0xe5   :  { %v219_v27 = vpop.f32.mrf.mxu1 }
  0xe6   :  { %v220_v34 = vadd.f32 %v219_v27, %v1522_v14  ;;  %v1564_v27 = vld [vmem:[#allocation7 + $0x2] ss:$0 sm:$0xff] }
  0xec   :  { %332 = vmatmul.bf16.gmra.mxu2 %v260_v55  ;;  %v1133_v55 = vld [vmem:[#allocation5 + $0x1c0] sm:$0xf] }
  0xed   :  { %v222_v33 = vpop.f32.mrf.mxu1  ;;  %v1134_v59 = vor.u32 %v1311_v56, %v1133_v55  ;;  %v1327_v55 = vld [vmem:[#allocation5 + $0x264] sm:$0xf]  ;;  %v1199_v56 = vld [vmem:[#allocation5 + $0x268] sm:$0xf0] }
  0xee   :  { %v223_v52 = vadd.f32 %v222_v33, %v1522_v14 }
  0xef   :  { %532 = vmatpush.bf16.msrb.mxu0 %v1134_v59  ;;  %v1325_v59 = vld [vmem:[#allocation5 + $0x254] sm:$0xf] }
  0xf3   :  { %533 = vmatpush.bf16.msrb.mxu0 %v1130_v3 }
  0xf5   :  { %v224_v45 = vpop.f32.mrf.mxu1 }
  0xf6   :  { %v225_v57 = vadd.f32 %v224_v45, %v1522_v14  ;;  %v1197_v45 = vld [vmem:[#allocation5 + $0x260] sm:$0xf] }
  0xf7   :  { %v1198_v49 = vor.u32 %v1328_v48, %v1197_v45  ;;  %v1315_v45 = vld [vmem:[#allocation5 + $0x204] sm:$0xf] }
  0xfd   :  { %v227_v0 = vpop.f32.mrf.mxu1 }
  0xfe   :  { %v228_v7 = vadd.f32 %v227_v0, %v1522_v14  ;;  %v1181_v0 = vld [vmem:[#allocation5 + $0x240] sm:$0xf] }
 0x105   :  { %v229_v5 = vpop.f32.mrf.mxu1 }
 0x106   :  { %v230_v10 = vadd.f32 %v229_v5, %v1522_v14 }
 0x13f   :  { %v318_v12 = vpop.f32.mrf.mxu2 }
 0x140   :  { %v319_v15 = vadd.f32 %v318_v12, %v1519_v13 }
 0x142   :  { %v338_v19 = vmax.f32 %v319_v15, 0.0 }
 0x144   :  { %v1528_v24 = vadd.f32 %v338_v19, %v213_v18  ;;  %v1309_v18 = vld [vmem:[#allocation5 + $0x1a4] sm:$0xf0] }
 0x147   :  { %v320_v17 = vpop.f32.mrf.mxu2 }
 0x148   :  { %v321_v21 = vadd.f32 %v320_v17, %v1519_v13  ;;  %v1125_v17 = vld [vmem:[#allocation5 + $0x1a0] sm:$0xf] }
 0x149   :  { %v1126_v19 = vor.u32 %v1309_v18, %v1125_v17 }
 0x14a   :  { %v339_v23 = vmax.f32 %v321_v21, 0.0  ;;  %v1121_v21 = vld [vmem:[#allocation5 + $0x190] sm:$0xf] }
 0x14b   :  { %534 = vmatpush.bf16.msrb.mxu0 %v1126_v19  ;;  %v1165_v19 = vld [vmem:[#allocation5 + $0x220] sm:$0xf] }
 0x14c   :  { %v1530_v25 = vadd.f32 %v339_v23, %v215_v22  ;;  %v1308_v22 = vld [vmem:[#allocation5 + $0x194] sm:$0xf0] }
 0x14d   :  { %v1122_v23 = vor.u32 %v1308_v22, %v1121_v21  ;;  %v1320_v21 = vld [vmem:[#allocation5 + $0x224] sm:$0xf0] }
 0x14e   :  { %v354_v20 = vpack.c.bf16 %v1530_v25, %v1528_v24 }
 0x14f   :  { %v323_v26 = vpop.f32.mrf.mxu2  ;;  %535 = vmatpush.bf16.msrb.mxu0 %v1122_v23  ;;  %v1166_v23 = vor.u32 %v1320_v21, %v1165_v19  ;;  %v1229_v21 = vld [vmem:[#allocation5 + $0x2c0] sm:$0xf] }
 0x150   :  { %431 = vmatmul.bf16.vlgmr.msra.gmra.mxu3 %v354_v20  ;;  %v324_v28 = vadd.f32 %v323_v26, %v1519_v13  ;;  %v1307_v20 = vld [vmem:[#allocation5 + $0x184] sm:$0xf0] }
 0x152   :  { %v340_v31 = vmax.f32 %v324_v28, 0.0 }
 0x154   :  { %v1538_v36 = vadd.f32 %v340_v31, %v218_v30 }
 0x157   :  { %v325_v29 = vpop.f32.mrf.mxu2 }
 0x158   :  { %v326_v32 = vadd.f32 %v325_v29, %v1519_v13 }
 0x15a   :  { %v341_v35 = vmax.f32 %v326_v32, 0.0 }
 0x15c   :  { %v1540_v37 = vadd.f32 %v341_v35, %v220_v34 }
 0x15e   :  { %v355_v38 = vpack.c.bf16 %v1540_v37, %v1538_v36 }
 0x15f   :  { %v328_v39 = vpop.f32.mrf.mxu2 }
 0x160   :  { %436 = vmatmul.bf16.gmra.mxu3 %v355_v38  ;;  %v329_v47 = vadd.f32 %v328_v39, %v1519_v13 }
 0x162   :  { %v342_v53 = vmax.f32 %v329_v47, 0.0  ;;  %v1206_v47 = vor.u32 %v1330_v44, %v1205_v43  ;;  %v1316_v44 = vld [vmem:[#allocation5 + $0x204] sm:$0xf0] }
 0x164   :  { %v1548_v60 = vadd.f32 %v342_v53, %v223_v52  ;;  %681 = vmatpush.bf16.msra.mxu1 %v1206_v47  ;;  %v1207_v52 = vld [vmem:[#allocation5 + $0x278] sm:$0xf0]  ;;  %v1326_v53 = vld [vmem:[#allocation5 + $0x254] sm:$0xf0]  ;;  %v1151_v47 = vld [vmem:[#allocation5 + $0x208] sm:$0xf0] }
 0x165   :  { %v1154_v48 = vor.u32 %v1315_v45, %v1151_v47  ;;  %v1213_v45 = vld [vmem:[#allocation5 + $0x280] sm:$0xf] }
 0x167   :  { %v330_v50 = vpop.f32.mrf.mxu2 }
 0x168   :  { %v331_v54 = vadd.f32 %v330_v50, %v1519_v13  ;;  %v1189_v50 = vld [vmem:[#allocation5 + $0x250] sm:$0xf]  ;;  %682 = vmatpush.bf16.msra.mxu1 %v1198_v49 }
 0x16a   :  { %v343_v58 = vmax.f32 %v331_v54, 0.0  ;;  %v1210_v54 = vor.u32 %v1329_v51, %v1207_v52 }
 0x16c   :  { %v1550_v61 = vadd.f32 %v343_v58, %v225_v57  ;;  %710 = vmatpush.bf16.msrb.mxu2 %v1210_v54  ;;  %v1202_v57 = vor.u32 %v1327_v55, %v1199_v56  ;;  %v1190_v58 = vor.u32 %v1326_v53, %v1189_v50  ;;  %v1574_v50 = vld [vmem:[#allocation7 + $0x3] ss:$0 sm:$0xff] }
 0x16e   :  { %v356_v1 = vpack.c.bf16 %v1550_v61, %v1548_v60  ;;  %683 = vmatpush.bf16.msra.mxu1 %v1190_v58 }
 0x16f   :  { %v333_v2 = vpop.f32.mrf.mxu2 }
 0x170   :  { %441 = vmatmul.bf16.gmra.mxu3 %v356_v1  ;;  %v334_v4 = vadd.f32 %v333_v2, %v1519_v13  ;;  %v1324_v1 = vld [vmem:[#allocation5 + $0x244] sm:$0xf0]  ;;  %711 = vmatpush.bf16.msrb.mxu2 %v1202_v57 }
 0x171   :  { %v1182_v5 = vor.u32 %v1324_v1, %v1181_v0 }
 0x172   :  { %v344_v8 = vmax.f32 %v334_v4, 0.0  ;;  %v1194_v4 = vor.u32 %v1325_v59, %v1191_v62 }
 0x173   :  { %684 = vmatpush.bf16.msra.mxu1 %v1182_v5 }
 0x174   :  { %v1558_v12 = vadd.f32 %v344_v8, %v228_v7  ;;  %v1183_v7 = vld [vmem:[#allocation5 + $0x248] sm:$0xf0]  ;;  %712 = vmatpush.bf16.msrb.mxu2 %v1194_v4 }
 0x177   :  { %v335_v6 = vpop.f32.mrf.mxu2 }
 0x178   :  { %v336_v9 = vadd.f32 %v335_v6, %v1519_v13  ;;  %v1117_v13 = vld [vmem:[#allocation5 + $0x180] sm:$0xf]  ;;  %v1323_v6 = vld [vmem:[#allocation5 + $0x244] sm:$0xf] }
 0x179   :  { %v1118_v14 = vor.u32 %v1307_v20, %v1117_v13  ;;  %v1186_v17 = vor.u32 %v1323_v6, %v1183_v7  ;;  %v1237_v7 = vld [vmem:[#allocation5 + $0x2e0] sm:$0xf] }
 0x17a   :  { %v345_v11 = vmax.f32 %v336_v9, 0.0 }
 0x17b   :  { %536 = vmatpush.bf16.msrb.mxu0 %v1118_v14  ;;  %713 = vmatpush.bf16.msrb.mxu2 %v1186_v17  ;;  %v1336_v17 = vld [vmem:[#allocation5 + $0x2d4] sm:$0xf0] }
 0x17c   :  { %v1560_v15 = vadd.f32 %v345_v11, %v230_v10  ;;  %v1173_v10 = vld [vmem:[#allocation5 + $0x230] sm:$0xf]  ;;  %v1322_v11 = vld [vmem:[#allocation5 + $0x234] sm:$0xf0] }
 0x17d   :  { %v1174_v18 = vor.u32 %v1322_v11, %v1173_v10 }
 0x17e   :  { %v357_v16 = vpack.c.bf16 %v1560_v15, %v1558_v12 }
 0x17f   :  { %685 = vmatpush.bf16.msra.mxu1 %v1174_v18 }
 0x180   :  { %446 = vmatmul.bf16.gmra.mxu3 %v357_v16 }
 0x183   :  { %686 = vmatpush.bf16.msra.mxu1 %v1166_v23 }
 0x1d3   :  { %v432_v26 = vpop.f32.mrf.mxu3 }
 0x1d4   :  { %v433_v28 = vadd.f32 %v432_v26, %v1564_v27 }
 0x1d6   :  { %v452_v31 = vmax.f32 %v433_v28, 0.0 }
 0x1db   :  { %v434_v29 = vpop.f32.mrf.mxu3 }
 0x1dc   :  { %v435_v30 = vadd.f32 %v434_v29, %v1564_v27 }
 0x1de   :  { %v453_v32 = vmax.f32 %v435_v30, 0.0  ;;  %v1321_v30 = vld [vmem:[#allocation5 + $0x234] sm:$0xf] }
 0x1e0   :  { %v477_v33 = vpack.c.bf16 %v453_v32, %v452_v31  ;;  %v1175_v31 = vld [vmem:[#allocation5 + $0x238] sm:$0xf0] }
 0x1e1   :  { %v1178_v32 = vor.u32 %v1321_v30, %v1175_v31 }
 0x1e2   :  { %537 = vmatmul.bf16.vlgmr.msrb.gmra.mxu0 %v477_v33  ;;  %v1319_v33 = vld [vmem:[#allocation5 + $0x224] sm:$0xf] }
 0x1e3   :  { %v437_v34 = vpop.f32.mrf.mxu3  ;;  %714 = vmatpush.bf16.msrb.mxu2 %v1178_v32  ;;  %v1221_v32 = vld [vmem:[#allocation5 + $0x2a0] sm:$0xf] }
 0x1e4   :  { %v438_v35 = vadd.f32 %v437_v34, %v1564_v27  ;;  %v1167_v34 = vld [vmem:[#allocation5 + $0x228] sm:$0xf0] }
 0x1e6   :  { %v454_v40 = vmax.f32 %v438_v35, 0.0  ;;  %v1170_v35 = vor.u32 %v1319_v33, %v1167_v34  ;;  %v1333_v33 = vld [vmem:[#allocation5 + $0x2a4] sm:$0xf0] }
 0x1e7   :  { %v1222_v34 = vor.u32 %v1333_v33, %v1221_v32  ;;  %v1249_v33 = vld [vmem:[#allocation5 + $0x310] sm:$0xf] }
 0x1e8   :  { %715 = vmatpush.bf16.msrb.mxu2 %v1170_v35 }
 0x1eb   :  { %v439_v38 = vpop.f32.mrf.mxu3 }
 0x1ec   :  { %v440_v39 = vadd.f32 %v439_v38, %v1564_v27  ;;  %v1157_v38 = vld [vmem:[#allocation5 + $0x210] sm:$0xf] }
 0x1ee   :  { %v455_v41 = vmax.f32 %v440_v39, 0.0  ;;  %v1318_v39 = vld [vmem:[#allocation5 + $0x214] sm:$0xf0] }
 0x1f0   :  { %v478_v42 = vpack.c.bf16 %v455_v41, %v454_v40  ;;  %v1158_v40 = vor.u32 %v1318_v39, %v1157_v38  ;;  %v1317_v41 = vld [vmem:[#allocation5 + $0x214] sm:$0xf]  ;;  %v1217_v38 = vld [vmem:[#allocation5 + $0x290] sm:$0xf]  ;;  %v1332_v39 = vld [vmem:[#allocation5 + $0x294] sm:$0xf0] }
 0x1f2   :  { %542 = vmatmul.bf16.gmra.mxu0 %v478_v42  ;;  %v1159_v42 = vld [vmem:[#allocation5 + $0x218] sm:$0xf0]  ;;  %687 = vmatpush.bf16.msra.mxu1 %v1158_v40 }
 0x1f3   :  { %v442_v46 = vpop.f32.mrf.mxu3  ;;  %v1162_v43 = vor.u32 %v1317_v41, %v1159_v42 }
 0x1f4   :  { %v443_v63 = vadd.f32 %v442_v46, %v1564_v27 }
 0x1f5   :  { %716 = vmatpush.bf16.msrb.mxu2 %v1162_v43 }
 0x1f6   :  { %v456_v8 = vmax.f32 %v443_v63, 0.0 }
 0x1f9   :  { %717 = vmatpush.bf16.msrb.mxu2 %v1154_v48  ;;  %v1592_v48 = vld [vmem:[#allocation7 + $0x4] ss:$8 sm:$0x3] }
 0x1fb   :  { %v444_v2 = vpop.f32.mrf.mxu3 }
 0x1fc   :  { %v445_v3 = vadd.f32 %v444_v2, %v1564_v27 }
 0x1fe   :  { %v457_v9 = vmax.f32 %v445_v3, 0.0 }
 0x200   :  { %v479_v16 = vpack.c.bf16 %v457_v9, %v456_v8  ;;  %v1337_v9 = vld [vmem:[#allocation5 + $0x2e4] sm:$0xf0] }
 0x201   :  { %v1238_v10 = vor.u32 %v1337_v9, %v1237_v7  ;;  %v1261_v9 = vld [vmem:[#allocation5 + $0x340] sm:$0xf] }
 0x202   :  { %547 = vmatmul.bf16.gmra.mxu0 %v479_v16  ;;  %v1233_v16 = vld [vmem:[#allocation5 + $0x2d0] sm:$0xf] }
 0x203   :  { %v447_v22 = vpop.f32.mrf.mxu3 }
 0x204   :  { %v448_v13 = vadd.f32 %v447_v22, %v1564_v27  ;;  %v1335_v22 = vld [vmem:[#allocation5 + $0x2c4] sm:$0xf0] }
 0x206   :  { %v458_v26 = vmax.f32 %v448_v13, 0.0  ;;  %v1230_v13 = vor.u32 %v1335_v22, %v1229_v21 }
 0x20b   :  { %v449_v20 = vpop.f32.mrf.mxu3 }
 0x20c   :  { %v450_v14 = vadd.f32 %v449_v20, %v1564_v27  ;;  %v1149_v27 = vld [vmem:[#allocation5 + $0x200] sm:$0xf] }
 0x20d   :  { %v1150_v46 = vor.u32 %v1316_v44, %v1149_v27 }
 0x20e   :  { %v459_v28 = vmax.f32 %v450_v14, 0.0 }
 0x20f   :  { %688 = vmatpush.bf16.msra.mxu1 %v1150_v46  ;;  %v1331_v46 = vld [vmem:[#allocation5 + $0x284] sm:$0xf0] }
 0x210   :  { %v480_v29 = vpack.c.bf16 %v459_v28, %v458_v26  ;;  %v1225_v26 = vld [vmem:[#allocation5 + $0x2b0] sm:$0xf]  ;;  %v1334_v28 = vld [vmem:[#allocation5 + $0x2b4] sm:$0xf0]  ;;  %v1214_v47 = vor.u32 %v1331_v46, %v1213_v45 }
 0x211   :  { %v1226_v31 = vor.u32 %v1334_v28, %v1225_v26  ;;  %v1257_v26 = vld [vmem:[#allocation5 + $0x330] sm:$0xf]  ;;  %v1342_v28 = vld [vmem:[#allocation5 + $0x334] sm:$0xf0] }
 0x212   :  { %552 = vmatmul.bf16.gmra.mxu0 %v480_v29 }
 0x25f   :  { %v538_v49 = vpop.f32.mrf.mxu0 }
 0x260   :  { %v539_v51 = vadd.f32 %v538_v49, %v1574_v50 }
 0x262   :  { %v558_v53 = vmax.f32 %v539_v51, 0.0  ;;  %v597_v51 = vperm.slane %v1592_v48, 0 }
 0x264   :  { %v566_v56 = vadd.f32 %v558_v53, %v1528_v24  ;;  %v1241_v24 = vld [vmem:[#allocation5 + $0x2f0] sm:$0xf] }
 0x267   :  { %v540_v52 = vpop.f32.mrf.mxu0 }
 0x268   :  { %v541_v54 = vadd.f32 %v540_v52, %v1574_v50 }
 0x26a   :  { %v559_v55 = vmax.f32 %v541_v54, 0.0 }
 0x26c   :  { %v567_v57 = vadd.f32 %v559_v55, %v1530_v25  ;;  %v1338_v25 = vld [vmem:[#allocation5 + $0x2f4] sm:$0xf0] }
 0x26d   :  { %v1242_v8 = vor.u32 %v1338_v25, %v1241_v24  ;;  %v1265_v24 = vld [vmem:[#allocation5 + $0x350] sm:$0xf]  ;;  %v1344_v25 = vld [vmem:[#allocation5 + $0x354] sm:$0xf0] }
 0x26e   :  { %v574_v58 = vpack.c.bf16 %v567_v57, %v566_v56  ;;  %v1266_v7 = vor.u32 %v1344_v25, %v1265_v24 }
 0x26f   :  { %v543_v59 = vpop.f32.mrf.mxu0  ;;  %816 = vmatpush.bf16.msrb.mxu3 %v1242_v8 }
 0x270   :  { %689 = vmatmul.bf16.vlgmr.msra.gmra.mxu1 %v574_v58  ;;  %718 = vmatmul.bf16.vlgmr.msrb.gmra.mxu2 %v574_v58  ;;  %v544_v62 = vadd.f32 %v543_v59, %v1574_v50 }
 0x272   :  { %v560_v0 = vmax.f32 %v544_v62, 0.0 }
 0x273   :  { %817 = vmatpush.bf16.msrb.mxu3 %v1238_v10  ;;  %v1343_v10 = vld [vmem:[#allocation5 + $0x344] sm:$0xf0] }
 0x274   :  { %v568_v3 = vadd.f32 %v560_v0, %v1538_v36  ;;  %v1234_v36 = vor.u32 %v1336_v17, %v1233_v16  ;;  %v1273_v0 = vld [vmem:[#allocation5 + $0x370] sm:$0xf]  ;;  %v1262_v17 = vor.u32 %v1343_v10, %v1261_v9 }
 0x277   :  { %v545_v63 = vpop.f32.mrf.mxu0  ;;  %818 = vmatpush.bf16.msrb.mxu3 %v1234_v36 }
 0x278   :  { %v546_v1 = vadd.f32 %v545_v63, %v1574_v50 }
 0x27a   :  { %v561_v2 = vmax.f32 %v546_v1, 0.0  ;;  %v1346_v1 = vld [vmem:[#allocation5 + $0x374] sm:$0xf0] }
 0x27b   :  { %819 = vmatpush.bf16.msrb.mxu3 %v1230_v13 }
 0x27c   :  { %v569_v4 = vadd.f32 %v561_v2, %v1540_v37  ;;  %v1269_v2 = vld [vmem:[#allocation5 + $0x360] sm:$0xf] }
 0x27e   :  { %v575_v5 = vpack.c.bf16 %v569_v4, %v568_v3  ;;  %v1274_v4 = vor.u32 %v1346_v1, %v1273_v0 }
 0x27f   :  { %v548_v6 = vpop.f32.mrf.mxu0  ;;  %820 = vmatpush.bf16.msrb.mxu3 %v1226_v31  ;;  %v1341_v31 = vld [vmem:[#allocation5 + $0x324] sm:$0xf0] }
 0x280   :  { %694 = vmatmul.bf16.gmra.mxu1 %v575_v5  ;;  %723 = vmatmul.bf16.gmra.mxu2 %v575_v5  ;;  %v549_v11 = vadd.f32 %v548_v6, %v1574_v50  ;;  %v1345_v5 = vld [vmem:[#allocation5 + $0x364] sm:$0xf0] }
 0x281   :  { %930 = vmatpush.bf16.msra.mxu0 %v1274_v4  ;;  %v1270_v6 = vor.u32 %v1345_v5, %v1269_v2  ;;  %1355 = vmatpush.bf16.msra.mxu2 %v1274_v4 }
 0x282   :  { %v562_v19 = vmax.f32 %v549_v11, 0.0 }
 0x283   :  { %821 = vmatpush.bf16.msrb.mxu3 %v1222_v34  ;;  %v1340_v34 = vld [vmem:[#allocation5 + $0x314] sm:$0xf0] }
 0x284   :  { %v570_v20 = vadd.f32 %v562_v19, %v1548_v60  ;;  %v1218_v60 = vor.u32 %v1332_v39, %v1217_v38  ;;  %v1245_v38 = vld [vmem:[#allocation5 + $0x300] sm:$0xf]  ;;  %v1339_v39 = vld [vmem:[#allocation5 + $0x304] sm:$0xf0] }
 0x285   :  { %931 = vmatpush.bf16.msra.mxu0 %v1270_v6  ;;  %1356 = vmatpush.bf16.msra.mxu2 %v1270_v6 }
 0x287   :  { %v550_v18 = vpop.f32.mrf.mxu0  ;;  %822 = vmatpush.bf16.msrb.mxu3 %v1218_v60 }
 0x288   :  { %v551_v37 = vadd.f32 %v550_v18, %v1574_v50 }
 0x289   :  { %932 = vmatpush.bf16.msra.mxu0 %v1266_v7  ;;  %1357 = vmatpush.bf16.msra.mxu2 %v1266_v7 }
 0x28a   :  { %v563_v23 = vmax.f32 %v551_v37, 0.0 }
 0x28b   :  { %823 = vmatpush.bf16.msrb.mxu3 %v1214_v47 }
 0x28c   :  { %v571_v14 = vadd.f32 %v563_v23, %v1550_v61 }
 0x28d   :  { %933 = vmatpush.bf16.msra.mxu0 %v1262_v17  ;;  %1358 = vmatpush.bf16.msra.mxu2 %v1262_v17 }
 0x28e   :  { %v576_v29 = vpack.c.bf16 %v571_v14, %v570_v20 }
 0x28f   :  { %v553_v30 = vpop.f32.mrf.mxu0 }
 0x290   :  { %699 = vmatmul.bf16.gmra.mxu1 %v576_v29  ;;  %728 = vmatmul.bf16.gmra.mxu2 %v576_v29  ;;  %v554_v35 = vadd.f32 %v553_v30, %v1574_v50  ;;  %v1258_v29 = vor.u32 %v1342_v28, %v1257_v26  ;;  %v1253_v30 = vld [vmem:[#allocation5 + $0x320] sm:$0xf] }
 0x291   :  { %v1254_v32 = vor.u32 %v1341_v31, %v1253_v30 }
 0x292   :  { %v564_v61 = vmax.f32 %v554_v35, 0.0  ;;  %934 = vmatpush.bf16.msra.mxu0 %v1258_v29  ;;  %1359 = vmatpush.bf16.msra.mxu2 %v1258_v29  ;;  %v1250_v35 = vor.u32 %v1340_v34, %v1249_v33  ;;  %v877_v29 = vld [vmem:[#allocation7 + $0x6] ss:$0 sm:$0xff] }
 0x294   :  { %v572_v43 = vadd.f32 %v564_v61, %v1558_v12 }
 0x296   :  { %935 = vmatpush.bf16.msra.mxu0 %v1254_v32  ;;  %1360 = vmatpush.bf16.msra.mxu2 %v1254_v32 }
 0x297   :  { %v555_v40 = vpop.f32.mrf.mxu0 }
 0x298   :  { %v556_v41 = vadd.f32 %v555_v40, %v1574_v50  ;;  %v1246_v40 = vor.u32 %v1339_v39, %v1245_v38 }
 0x29a   :  { %v565_v42 = vmax.f32 %v556_v41, 0.0  ;;  %936 = vmatpush.bf16.msra.mxu0 %v1250_v35  ;;  %1361 = vmatpush.bf16.msra.mxu2 %v1250_v35 }
 0x29c   :  { %v573_v27 = vadd.f32 %v565_v42, %v1560_v15  ;;  %v763_v42 = vld [vmem:[#allocation7 + $0x5] ss:$0 sm:$0xff] }
 0x29e   :  { %v577_v44 = vpack.c.bf16 %v573_v27, %v572_v43  ;;  %937 = vmatpush.bf16.msra.mxu0 %v1246_v40  ;;  %1362 = vmatpush.bf16.msra.mxu2 %v1246_v40 }
 0x2a0   :  { %704 = vmatmul.bf16.gmra.mxu1 %v577_v44  ;;  %733 = vmatmul.bf16.gmra.mxu2 %v577_v44  ;;  %v598_v44 = vperm.slane %v1592_v48, 1 }
 0x2ed   :  { %v690_v49 = vpop.f32.mrf.mxu1 }
 0x2ee   :  { %v691_v52 = vadd.f32 %v690_v49, %v597_v51 }
 0x2f0   :  { %v739_v54 = vmax.f32 %v691_v52, 0.0 }
 0x2f3   :  { %v719_v60 = vpop.f32.mrf.mxu2 }
 0x2f4   :  { %v720_v49 = vadd.f32 %v719_v60, %v598_v44 }
 0x2f5   :  { %v692_v50 = vpop.f32.mrf.mxu1 }
 0x2f6   :  { %v693_v53 = vadd.f32 %v692_v50, %v597_v51 }
 0x2f8   :  { %v740_v55 = vmax.f32 %v693_v53, 0.0 }
 0x2fa   :  { %v764_v12 = vpack.c.bf16 %v740_v55, %v739_v54 }
 0x2fb   :  { %v721_v61 = vpop.f32.mrf.mxu2 }
 0x2fc   :  { %824 = vmatmul.bf16.vlgmr.msrb.gmra.mxu3 %v764_v12 }
 0x2fd   :  { %v695_v15 = vpop.f32.mrf.mxu1 }
 0x2fe   :  { %v696_v56 = vadd.f32 %v695_v15, %v597_v51 }
 0x300   :  { %v741_v59 = vmax.f32 %v696_v56, 0.0 }
 0x303   :  { %v724_v27 = vpop.f32.mrf.mxu2 }
 0x305   :  { %v697_v57 = vpop.f32.mrf.mxu1 }
 0x306   :  { %v698_v58 = vadd.f32 %v697_v57, %v597_v51 }
 0x308   :  { %v742_v62 = vmax.f32 %v698_v58, 0.0 }
 0x30a   :  { %v765_v63 = vpack.c.bf16 %v742_v62, %v741_v59  ;;  %v725_v62 = vadd.f32 %v724_v27, %v598_v44 }
 0x30b   :  { %v726_v55 = vpop.f32.mrf.mxu2 }
 0x30c   :  { %829 = vmatmul.bf16.gmra.mxu3 %v765_v63  ;;  %v727_v63 = vadd.f32 %v726_v55, %v598_v44 }
 0x30d   :  { %v700_v3 = vpop.f32.mrf.mxu1 }
 0x30e   :  { %v701_v8 = vadd.f32 %v700_v3, %v597_v51 }
 0x310   :  { %v743_v18 = vmax.f32 %v701_v8, 0.0 }
 0x313   :  { %v729_v59 = vpop.f32.mrf.mxu2 }
 0x314   :  { %v730_v7 = vadd.f32 %v729_v59, %v598_v44 }
 0x315   :  { %v702_v11 = vpop.f32.mrf.mxu1 }
 0x316   :  { %v703_v16 = vadd.f32 %v702_v11, %v597_v51 }
 0x318   :  { %v744_v36 = vmax.f32 %v703_v16, 0.0 }
 0x31a   :  { %v766_v19 = vpack.c.bf16 %v744_v36, %v743_v18 }
 0x31b   :  { %v731_v4 = vpop.f32.mrf.mxu2 }
 0x31c   :  { %834 = vmatmul.bf16.gmra.mxu3 %v766_v19  ;;  %v732_v8 = vadd.f32 %v731_v4, %v598_v44 }
 0x31d   :  { %v705_v37 = vpop.f32.mrf.mxu1 }
 0x31e   :  { %v706_v21 = vadd.f32 %v705_v37, %v597_v51 }
 0x320   :  { %v745_v13 = vmax.f32 %v706_v21, 0.0 }
 0x323   :  { %v734_v16 = vpop.f32.mrf.mxu2 }
 0x325   :  { %v707_v22 = vpop.f32.mrf.mxu1 }
 0x326   :  { %v708_v23 = vadd.f32 %v707_v22, %v597_v51  ;;  %v722_v51 = vadd.f32 %v721_v61, %v598_v44 }
 0x328   :  { %v746_v20 = vmax.f32 %v708_v23, 0.0  ;;  %v735_v23 = vadd.f32 %v734_v16, %v598_v44 }
 0x32a   :  { %v767_v14 = vpack.c.bf16 %v746_v20, %v745_v13 }
 0x32b   :  { %v736_v19 = vpop.f32.mrf.mxu2 }
 0x32c   :  { %839 = vmatmul.bf16.gmra.mxu3 %v767_v14  ;;  %v737_v13 = vadd.f32 %v736_v19, %v598_v44 }
 0x37f   :  { %v825_v41 = vpop.f32.mrf.mxu3 }
 0x380   :  { %v826_v43 = vadd.f32 %v825_v41, %v763_v42 }
 0x382   :  { %v845_v46 = vmax.f32 %v826_v43, 0.0 }
 0x384   :  { %v853_v50 = vadd.f32 %v845_v46, %v720_v49 }
 0x387   :  { %v827_v45 = vpop.f32.mrf.mxu3 }
 0x388   :  { %v828_v47 = vadd.f32 %v827_v45, %v763_v42 }
 0x38a   :  { %v846_v52 = vmax.f32 %v828_v47, 0.0 }
 0x38c   :  { %v854_v53 = vadd.f32 %v846_v52, %v722_v51 }
 0x38e   :  { %v878_v54 = vpack.c.bf16 %v854_v53, %v853_v50 }
 0x38f   :  { %v830_v12 = vpop.f32.mrf.mxu3 }
 0x390   :  { %938 = vmatmul.bf16.vlgmr.msra.gmra.mxu0 %v878_v54  ;;  %v831_v15 = vadd.f32 %v830_v12, %v763_v42 }
 0x392   :  { %v847_v57 = vmax.f32 %v831_v15, 0.0 }
 0x394   :  { %v855_v0 = vadd.f32 %v847_v57, %v725_v62 }
 0x397   :  { %v832_v56 = vpop.f32.mrf.mxu3 }
 0x398   :  { %v833_v58 = vadd.f32 %v832_v56, %v763_v42 }
 0x39a   :  { %v848_v48 = vmax.f32 %v833_v58, 0.0 }
 0x39c   :  { %v856_v1 = vadd.f32 %v848_v48, %v727_v63 }
 0x39e   :  { %v879_v2 = vpack.c.bf16 %v856_v1, %v855_v0 }
 0x39f   :  { %v835_v3 = vpop.f32.mrf.mxu3 }
 0x3a0   :  { %943 = vmatmul.bf16.gmra.mxu0 %v879_v2  ;;  %v836_v5 = vadd.f32 %v835_v3, %v763_v42 }
 0x3a2   :  { %v849_v24 = vmax.f32 %v836_v5, 0.0 }
 0x3a4   :  { %v857_v10 = vadd.f32 %v849_v24, %v730_v7 }
 0x3a7   :  { %v837_v6 = vpop.f32.mrf.mxu3 }
 0x3a8   :  { %v838_v25 = vadd.f32 %v837_v6, %v763_v42 }
 0x3aa   :  { %v850_v9 = vmax.f32 %v838_v25, 0.0 }
 0x3ac   :  { %v858_v11 = vadd.f32 %v850_v9, %v732_v8 }
 0x3ae   :  { %v880_v17 = vpack.c.bf16 %v858_v11, %v857_v10 }
 0x3af   :  { %v840_v18 = vpop.f32.mrf.mxu3 }
 0x3b0   :  { %948 = vmatmul.bf16.gmra.mxu0 %v880_v17  ;;  %v841_v36 = vadd.f32 %v840_v18, %v763_v42 }
 0x3b2   :  { %v851_v21 = vmax.f32 %v841_v36, 0.0 }
 0x3b4   :  { %v859_v14 = vadd.f32 %v851_v21, %v735_v23 }
 0x3b7   :  { %v842_v37 = vpop.f32.mrf.mxu3 }
 0x3b8   :  { %v843_v22 = vadd.f32 %v842_v37, %v763_v42 }
 0x3ba   :  { %v852_v20 = vmax.f32 %v843_v22, 0.0 }
 0x3bc   :  { %v860_v26 = vadd.f32 %v852_v20, %v737_v13 }
 0x3be   :  { %v881_v28 = vpack.c.bf16 %v860_v26, %v859_v14 }
 0x3c0   :  { %953 = vmatmul.bf16.vlgmr.msra.gmra.mxu2 %v881_v28 }
 0x40d   :  { %v939_v30 = vpop.f32.mrf.mxu0 }
 0x40e   :  { %v940_v31 = vadd.f32 %v939_v30, %v877_v29 }
 0x410   :  { %959 = vst [vmem:[#allocation8] sm:$0xff] %v940_v31 }
 0x415   :  { %v941_v32 = vpop.f32.mrf.mxu0 }
 0x416   :  { %v942_v33 = vadd.f32 %v941_v32, %v877_v29 }
 0x418   :  { %960 = vst [vmem:[#allocation8 + $0x8] sm:$0xff] %v942_v33 }
 0x41d   :  { %v944_v34 = vpop.f32.mrf.mxu0 }
 0x41e   :  { %v945_v35 = vadd.f32 %v944_v34, %v877_v29 }
 0x420   :  { %961 = vst [vmem:[#allocation8 + $0x10] sm:$0xff] %v945_v35 }
 0x425   :  { %v946_v38 = vpop.f32.mrf.mxu0 }
 0x426   :  { %v947_v39 = vadd.f32 %v946_v38, %v877_v29 }
 0x428   :  { %962 = vst [vmem:[#allocation8 + $0x18] sm:$0xff] %v947_v39 }
 0x42d   :  { %v949_v40 = vpop.f32.mrf.mxu0 }
 0x42e   :  { %v950_v60 = vadd.f32 %v949_v40, %v877_v29 }
 0x430   :  { %963 = vst [vmem:[#allocation8 + $0x20] sm:$0xff] %v950_v60 }
 0x435   :  { %v951_v61 = vpop.f32.mrf.mxu0 }
 0x436   :  { %v952_v41 = vadd.f32 %v951_v61, %v877_v29 }
 0x438   :  { %964 = vst [vmem:[#allocation8 + $0x28] sm:$0xff] %v952_v41 }
 0x443   :  { %v954_v42 = vpop.f32.mrf.mxu2 }
 0x444   :  { %v955_v43 = vadd.f32 %v954_v42, %v877_v29 }
 0x446   :  { %965 = vst [vmem:[#allocation8 + $0x30] sm:$0xff] %v955_v43 }
 0x44b   :  { %v956_v27 = vpop.f32.mrf.mxu2 }
 0x44c   :  { %v957_v44 = vadd.f32 %v956_v27, %v877_v29 }
 0x44e   :  { %966 = vst [vmem:[#allocation8 + $0x38] sm:$0xff] %v957_v44 }
 0x44f   :  { %979 = dma.vmem_to_hbm [thread:$0]  %s972_s27, 1024, %s974_s30, [#allocation4], %s1472_s20, %s1472_s20, %s1473_s21  }
 0x450   :  { %1469 = dma.done.wait [#allocation4], 1024  }
 0x451   :  { %1470 = vsyncadd [#allocation4], 4294966272 }
 0x452   :  { %984 = vsyncpa [#allocation3], 1 }
 0x453   :  { %985 = vsyncpa [#allocation6], 1 }
 0x454   :  { %986 = vsyncpa [#allocation4], 1 }

</bundles_post_ra>
